<compile_context>
chip_gen: v5e
topology: v5e:2x2
jax: 0.10.0
libtpu: 0.0.40
codegen_flags: <defaults>
</compile_context>

<pallas_src>
import numpy as np

import jax
import jax.numpy as jnp
from jax.experimental import pallas as pl
from jax.experimental.pallas import tpu as pltpu


# ----------------------------------------------------------------------------
# Fused TemporalBlock (one pallas_call per block)
# ----------------------------------------------------------------------------
def temporal_block(x2d, blk, *, B, L, dilation, lin=None):
    """One fused TemporalBlock.

    x2d: (C_in, B*L) float32 activation, batch folded into the lane axis.
    Returns (C_out, B*L) float32, or (out_size, B) float32 if `lin` is given
    (last block: the last-time-step Linear head is fused in).
    """
    C_in, BL = x2d.shape
    assert BL == B * L
    w1, b1v, w2, b2v = blk["w1"], blk["b1"], blk["w2"], blk["b2"]
    C_out, _, K = w1.shape
    pad = (K - 1) * dilation
    has_ds = blk["downsample"] is not None
    fuse_lin = lin is not None

    # Stacked-tap weights: (C_out, K*C), tap-major, so one deep MXU matmul
    # replaces K shallow ones.  Stored/DMA'd as bf16.
    w1s = jnp.transpose(w1, (0, 2, 1)).reshape(C_out, K * C_in).astype(jnp.bfloat16)
    w2s = jnp.transpose(w2, (0, 2, 1)).reshape(C_out, K * C_out).astype(jnp.bfloat16)

    args = [x2d,
            w1s, b1v.reshape(C_out, 1).astype(jnp.float32),
            w2s, b2v.reshape(C_out, 1).astype(jnp.float32)]
    if has_ds:
        args.append(blk["downsample"]["w"][:, :, 0].astype(jnp.bfloat16))   # (C_out, C_in)
        args.append(blk["downsample"]["b"].reshape(C_out, 1).astype(jnp.float32))
    if fuse_lin:
        lw, lb = lin
        out_size = lw.shape[0]
        # One-hot selector picking the last time step of every batch segment
        # (keeps the extraction on the MXU, no tiny lane slices).
        sel = np.zeros((BL, B), np.float32)
        for bb in range(B):
            sel[(bb + 1) * L - 1, bb] = 1.0
        args.append(jnp.asarray(sel))
        args.append(lw.astype(jnp.float32))                                  # (out, C_out)
        args.append(lb.reshape(out_size, 1).astype(jnp.float32))
        out_shape = jax.ShapeDtypeStruct((out_size, B), jnp.float32)
    else:
        out_shape = jax.ShapeDtypeStruct((C_out, BL), jnp.float32)

    def _causal_conv_stacked(x_f32, w_ref, b_ref):
        """Dilated causal conv as ONE stacked-tap matmul, entirely in VMEM."""
        C = x_f32.shape[0]
        # Causal zero padding handled in-register (no HBM jnp.pad round trip).
        xp = x_f32 if pad == 0 else jnp.concatenate(
            [jnp.zeros((C, pad), jnp.float32), x_f32], axis=1)      # (C, pad+BL)
        # Position of each lane inside its batch segment: shifts must not leak
        # across segment boundaries (batch is folded into the lane axis).
        iota = jax.lax.broadcasted_iota(jnp.int32, (C, BL), 1)
        pos = iota
        for bb in range(1, B):                       # static small-B loop
            pos = pos - jnp.where(iota >= bb * L, L, 0)
        taps = []
        for t in range(K):                           # static, K small
            s = (K - 1 - t) * dilation               # causal right-shift for tap t
            shifted = xp[:, pad - s: pad - s + BL]
            if s:
                shifted = jnp.where(pos >= s, shifted, 0.0)
            taps.append(shifted)
        stacked = jnp.concatenate(taps, axis=0)      # (K*C, B*L)
        acc = jnp.dot(w_ref[...], stacked.astype(jnp.bfloat16),
                      preferred_element_type=jnp.float32)   # bf16 MXU, f32 accum
        return acc + b_ref[...]

    def kernel(*refs):
        it = iter(refs)
        x_ref = next(it)
        w1_ref, b1_ref, w2_ref, b2_ref = next(it), next(it), next(it), next(it)
        wd_ref = next(it) if has_ds else None
        bd_ref = next(it) if has_ds else None
        sel_ref = next(it) if fuse_lin else None
        lw_ref = next(it) if fuse_lin else None
        lb_ref = next(it) if fuse_lin else None
        out_ref = next(it)

        x = x_ref[...].astype(jnp.float32)
        # conv1 -> chomp -> ReLU            (dropout = identity at inference)
        y1 = jnp.maximum(_causal_conv_stacked(x, w1_ref, b1_ref), 0.0)
        # Residual branch: identity, or 1x1 downsample conv when channels change.
        if has_ds:
            res = jnp.dot(wd_ref[...], x.astype(jnp.bfloat16),
                          preferred_element_type=jnp.float32) + bd_ref[...]
        else:
            res = x
        # conv2 -> chomp -> (dropout) fused with residual add + final ReLU.
        y2 = jnp.maximum(_causal_conv_stacked(y1, w2_ref, b2_ref) + res, 0.0)

        if fuse_lin:
            # Fused head: y[:, :, -1] per batch via one-hot matmul, then Linear.
            last = jnp.dot(y2, sel_ref[...],
                           preferred_element_type=jnp.float32)        # (C_out, B)
            out_ref[...] = (jnp.dot(lw_ref[...], last,
                                    preferred_element_type=jnp.float32)
                            + lb_ref[...]).astype(out_ref.dtype)
        else:
            out_ref[...] = y2.astype(out_ref.dtype)

    return pl.pallas_call(
        kernel,
        out_shape=out_shape,
        grid=(1,),
        in_specs=[pl.BlockSpec(a.shape, lambda i: (0, 0)) for a in args],
        out_specs=pl.BlockSpec(out_shape.shape, lambda i: (0, 0)),
        compiler_params=pltpu.CompilerParams(
            dimension_semantics=("arbitrary",),
            # Tiny tiles here; explicit (conservative) budget, safe on v7x too.
            vmem_limit_bytes=32 * 1024 * 1024),
    )(*args)


# ----------------------------------------------------------------------------
# TCN forward pass (mirrors TCN.forward: y = tcn(x); o = linear(y[:, :, -1]))
# ----------------------------------------------------------------------------
def tcn_forward(x, params):
    B, C_in, L = x.shape
    # Fold batch into the lane axis once: (B, C, L) -> (C, B*L).
    y = jnp.transpose(x, (1, 0, 2)).reshape(C_in, B * L)
    blocks = params["blocks"]
    for i, blk in enumerate(blocks):
        is_last = i == len(blocks) - 1
        y = temporal_block(
            y, blk, B=B, L=L, dilation=2 ** i,
            lin=(params["lin_w"], params["lin_b"]) if is_last else None)
    return jnp.transpose(y)                      # (out_size, B) -> (B, out_size)


# ----------------------------------------------------------------------------
# Pure-JAX reference (f32) for correctness checking
# ----------------------------------------------------------------------------
def tcn_reference(x, params):
    def causal_conv(h, w, b, d):
        K = w.shape[2]
        p = (K - 1) * d
        hp = jnp.pad(h, ((0, 0), (0, 0), (p, 0)))
        Ls = h.shape[2]
        out = jnp.zeros((h.shape[0], w.shape[0], Ls), jnp.float32)
        for t in range(K):
            out = out + jnp.einsum("oc,bcl->bol", w[:, :, t],
                                   hp[:, :, t * d: t * d + Ls])
        return out + b[None, :, None]

    y = x
    for i, blk in enumerate(params["blocks"]):
        d = 2 ** i
        h = jax.nn.relu(causal_conv(y, blk["w1"], blk["b1"], d))
        res = y if blk["downsample"] is None else causal_conv(
            y, blk["downsample"]["w"], blk["downsample"]["b"], 1)
        y = jax.nn.relu(causal_conv(h, blk["w2"], blk["b2"], d) + res)
    return y[:, :, -1] @ params["lin_w"].T + params["lin_b"]


# ----------------------------------------------------------------------------
# Deterministic synthetic parameter init (shapes per TCN.__init__)
# ----------------------------------------------------------------------------
def init_params(key, input_size, output_size, num_channels, kernel_size):
    blocks = []
    for i, out_ch in enumerate(num_channels):
        in_ch = input_size if i == 0 else num_channels[i - 1]
        key, k1, k2, k3, k4, k5, k6 = jax.random.split(key, 7)
        blk = {
            "w1": jax.random.normal(k1, (out_ch, in_ch, kernel_size), jnp.float32) * 0.1,
            "b1": jax.random.normal(k2, (out_ch,), jnp.float32) * 0.01,
            "w2": jax.random.normal(k3, (out_ch, out_ch, kernel_size), jnp.float32) * 0.1,
            "b2": jax.random.normal(k4, (out_ch,), jnp.float32) * 0.01,
            "downsample": None,
        }
        if in_ch != out_ch:
            blk["downsample"] = {
                "w": jax.random.normal(k5, (out_ch, in_ch, 1), jnp.float32) * 0.1,
                "b": jax.random.normal(k6, (out_ch,), jnp.float32) * 0.01,
            }
        blocks.append(blk)
    key, kl = jax.random.split(key)
    return {
        "blocks": blocks,
        # nn.Linear(num_channels[-1], output_size): weight ~ N(0, 0.01)
        "lin_w": jax.random.normal(kl, (output_size, num_channels[-1]), jnp.float32) * 0.01,
        "lin_b": jnp.zeros((output_size,), jnp.float32),
    }


if __name__ == "__main__":
    key = jax.random.PRNGKey(0)
    B, C_in, L = 2, 8, 16          # (batch, input channels, signal length)
    num_channels = [16, 16]        # block 0 has a 1x1 downsample (8 -> 16)
    kernel_size = 3
    output_size = 5

    pkey, xkey = jax.random.split(key)
    params = init_params(pkey, C_in, output_size, num_channels, kernel_size)
    x = jax.random.normal(xkey, (B, C_in, L), jnp.float32)

    out = jax.jit(tcn_forward)(x, params)
    out = jax.block_until_ready(out)
    assert out.shape == (B, output_size), out.shape
    assert bool(jnp.all(jnp.isfinite(out)))

    ref = tcn_reference(x, params)
    max_err = float(jnp.max(jnp.abs(out - ref)))
    assert jnp.allclose(out, ref, rtol=5e-2, atol=5e-3), max_err

    print("KERNEL_OK")
</pallas_src>

<mosaic_0001>
module attributes {stable_mosaic.version = 11 : i64} {
  func.func @kernel(%arg0: i32, %arg1: memref<8x32xf32, #tpu.memory_space<vmem>>, %arg2: memref<16x24xbf16, #tpu.memory_space<vmem>>, %arg3: memref<16x1xf32, #tpu.memory_space<vmem>>, %arg4: memref<16x48xbf16, #tpu.memory_space<vmem>>, %arg5: memref<16x1xf32, #tpu.memory_space<vmem>>, %arg6: memref<16x8xbf16, #tpu.memory_space<vmem>>, %arg7: memref<16x1xf32, #tpu.memory_space<vmem>>, %arg8: memref<16x32xf32, #tpu.memory_space<vmem>>) attributes {dimension_semantics = [#tpu.dimension_semantics<arbitrary>], iteration_bounds = array<i64: 1>, scalar_prefetch = 0 : i64, scratch_operands = 0 : i64, tpu.core_type = #tpu.core_type<tc>, window_params = [{pipeline_mode = #tpu.pipeline_mode<synchronous>, transform_indices = @transform_0, window_bounds = array<i64: 8, 32>}, {pipeline_mode = #tpu.pipeline_mode<synchronous>, transform_indices = @transform_1, window_bounds = array<i64: 16, 24>}, {pipeline_mode = #tpu.pipeline_mode<synchronous>, transform_indices = @transform_2, window_bounds = array<i64: 16, 1>}, {pipeline_mode = #tpu.pipeline_mode<synchronous>, transform_indices = @transform_3, window_bounds = array<i64: 16, 48>}, {pipeline_mode = #tpu.pipeline_mode<synchronous>, transform_indices = @transform_4, window_bounds = array<i64: 16, 1>}, {pipeline_mode = #tpu.pipeline_mode<synchronous>, transform_indices = @transform_5, window_bounds = array<i64: 16, 8>}, {pipeline_mode = #tpu.pipeline_mode<synchronous>, transform_indices = @transform_6, window_bounds = array<i64: 16, 1>}, {pipeline_mode = #tpu.pipeline_mode<synchronous>, transform_indices = @transform_7, window_bounds = array<i64: 16, 32>}]} {
    %c0 = arith.constant 0 : index
    %c0_0 = arith.constant 0 : index
    %0 = vector.load %arg1[%c0, %c0_0] : memref<8x32xf32, #tpu.memory_space<vmem>>, vector<8x32xf32>
    %cst = arith.constant 0.000000e+00 : f32
    %1 = vector.broadcast %cst : f32 to vector<8x2xf32>
    %2 = tpu.concatenate %1, %0 in 1 : vector<8x2xf32>, vector<8x32xf32> -> vector<8x34xf32>
    %3 = tpu.iota {dimensions = array<i32: 1>} : vector<8x32xi32>
    %c16_i32 = arith.constant 16 : i32
    %4 = vector.broadcast %c16_i32 : i32 to vector<8x32xi32>
    %5 = arith.cmpi sge, %3, %4 : vector<8x32xi32>
    %c16_i32_1 = arith.constant 16 : i32
    %c0_i32 = arith.constant 0 : i32
    %6 = vector.broadcast %c16_i32_1 : i32 to vector<8x32xi32>
    %7 = vector.broadcast %c0_i32 : i32 to vector<8x32xi32>
    %8 = arith.select %5, %6, %7 : vector<8x32xi1>, vector<8x32xi32>
    %9 = arith.subi %3, %8 : vector<8x32xi32>
    %10 = vector.extract_strided_slice %2 {offsets = [0, 0], sizes = [8, 32], strides = [1, 1]} : vector<8x34xf32> to vector<8x32xf32>
    %c2_i32 = arith.constant 2 : i32
    %11 = vector.broadcast %c2_i32 : i32 to vector<8x32xi32>
    %12 = arith.cmpi sge, %9, %11 : vector<8x32xi32>
    %cst_2 = arith.constant 0.000000e+00 : f32
    %13 = vector.broadcast %cst_2 : f32 to vector<8x32xf32>
    %14 = arith.select %12, %10, %13 : vector<8x32xi1>, vector<8x32xf32>
    %15 = vector.extract_strided_slice %2 {offsets = [0, 1], sizes = [8, 32], strides = [1, 1]} : vector<8x34xf32> to vector<8x32xf32>
    %c1_i32 = arith.constant 1 : i32
    %16 = vector.broadcast %c1_i32 : i32 to vector<8x32xi32>
    %17 = arith.cmpi sge, %9, %16 : vector<8x32xi32>
    %cst_3 = arith.constant 0.000000e+00 : f32
    %18 = vector.broadcast %cst_3 : f32 to vector<8x32xf32>
    %19 = arith.select %17, %15, %18 : vector<8x32xi1>, vector<8x32xf32>
    %20 = vector.extract_strided_slice %2 {offsets = [0, 2], sizes = [8, 32], strides = [1, 1]} : vector<8x34xf32> to vector<8x32xf32>
    %21 = tpu.concatenate %14, %19, %20 in 0 : vector<8x32xf32>, vector<8x32xf32>, vector<8x32xf32> -> vector<24x32xf32>
    %c0_4 = arith.constant 0 : index
    %c0_5 = arith.constant 0 : index
    %22 = vector.load %arg2[%c0_4, %c0_5] : memref<16x24xbf16, #tpu.memory_space<vmem>>, vector<16x24xbf16>
    %23 = arith.truncf %21 : vector<24x32xf32> to vector<24x32xbf16>
    %cst_6 = arith.constant dense<0.000000e+00> : vector<16x32xf32>
    %24 = tpu.matmul %22, %23, %cst_6 {dimension_numbers = #tpu.dot_dimension_numbers<[1], [0], [0], [1], [0, 0, 1, 1], [], []>} : vector<16x24xbf16>, vector<24x32xbf16>, vector<16x32xf32> -> vector<16x32xf32>
    %c0_7 = arith.constant 0 : index
    %c0_8 = arith.constant 0 : index
    %25 = vector.load %arg3[%c0_7, %c0_8] : memref<16x1xf32, #tpu.memory_space<vmem>>, vector<16x1xf32>
    %26 = vector.broadcast %25 : vector<16x1xf32> to vector<16x32xf32>
    %27 = arith.addf %24, %26 : vector<16x32xf32>
    %cst_9 = arith.constant 0.000000e+00 : f32
    %28 = vector.broadcast %cst_9 : f32 to vector<16x32xf32>
    %29 = arith.maximumf %27, %28 : vector<16x32xf32>
    %c0_10 = arith.constant 0 : index
    %c0_11 = arith.constant 0 : index
    %30 = vector.load %arg6[%c0_10, %c0_11] : memref<16x8xbf16, #tpu.memory_space<vmem>>, vector<16x8xbf16>
    %31 = arith.truncf %0 : vector<8x32xf32> to vector<8x32xbf16>
    %cst_12 = arith.constant dense<0.000000e+00> : vector<16x32xf32>
    %32 = tpu.matmul %30, %31, %cst_12 {dimension_numbers = #tpu.dot_dimension_numbers<[1], [0], [0], [1], [0, 0, 1, 1], [], []>} : vector<16x8xbf16>, vector<8x32xbf16>, vector<16x32xf32> -> vector<16x32xf32>
    %c0_13 = arith.constant 0 : index
    %c0_14 = arith.constant 0 : index
    %33 = vector.load %arg7[%c0_13, %c0_14] : memref<16x1xf32, #tpu.memory_space<vmem>>, vector<16x1xf32>
    %34 = vector.broadcast %33 : vector<16x1xf32> to vector<16x32xf32>
    %35 = arith.addf %32, %34 : vector<16x32xf32>
    %cst_15 = arith.constant 0.000000e+00 : f32
    %36 = vector.broadcast %cst_15 : f32 to vector<16x2xf32>
    %37 = tpu.concatenate %36, %29 in 1 : vector<16x2xf32>, vector<16x32xf32> -> vector<16x34xf32>
    %38 = tpu.iota {dimensions = array<i32: 1>} : vector<16x32xi32>
    %c16_i32_16 = arith.constant 16 : i32
    %39 = vector.broadcast %c16_i32_16 : i32 to vector<16x32xi32>
    %40 = arith.cmpi sge, %38, %39 : vector<16x32xi32>
    %c16_i32_17 = arith.constant 16 : i32
    %c0_i32_18 = arith.constant 0 : i32
    %41 = vector.broadcast %c16_i32_17 : i32 to vector<16x32xi32>
    %42 = vector.broadcast %c0_i32_18 : i32 to vector<16x32xi32>
    %43 = arith.select %40, %41, %42 : vector<16x32xi1>, vector<16x32xi32>
    %44 = arith.subi %38, %43 : vector<16x32xi32>
    %45 = vector.extract_strided_slice %37 {offsets = [0, 0], sizes = [16, 32], strides = [1, 1]} : vector<16x34xf32> to vector<16x32xf32>
    %c2_i32_19 = arith.constant 2 : i32
    %46 = vector.broadcast %c2_i32_19 : i32 to vector<16x32xi32>
    %47 = arith.cmpi sge, %44, %46 : vector<16x32xi32>
    %cst_20 = arith.constant 0.000000e+00 : f32
    %48 = vector.broadcast %cst_20 : f32 to vector<16x32xf32>
    %49 = arith.select %47, %45, %48 : vector<16x32xi1>, vector<16x32xf32>
    %50 = vector.extract_strided_slice %37 {offsets = [0, 1], sizes = [16, 32], strides = [1, 1]} : vector<16x34xf32> to vector<16x32xf32>
    %c1_i32_21 = arith.constant 1 : i32
    %51 = vector.broadcast %c1_i32_21 : i32 to vector<16x32xi32>
    %52 = arith.cmpi sge, %44, %51 : vector<16x32xi32>
    %cst_22 = arith.constant 0.000000e+00 : f32
    %53 = vector.broadcast %cst_22 : f32 to vector<16x32xf32>
    %54 = arith.select %52, %50, %53 : vector<16x32xi1>, vector<16x32xf32>
    %55 = vector.extract_strided_slice %37 {offsets = [0, 2], sizes = [16, 32], strides = [1, 1]} : vector<16x34xf32> to vector<16x32xf32>
    %56 = tpu.concatenate %49, %54, %55 in 0 : vector<16x32xf32>, vector<16x32xf32>, vector<16x32xf32> -> vector<48x32xf32>
    %c0_23 = arith.constant 0 : index
    %c0_24 = arith.constant 0 : index
    %57 = vector.load %arg4[%c0_23, %c0_24] : memref<16x48xbf16, #tpu.memory_space<vmem>>, vector<16x48xbf16>
    %58 = arith.truncf %56 : vector<48x32xf32> to vector<48x32xbf16>
    %cst_25 = arith.constant dense<0.000000e+00> : vector<16x32xf32>
    %59 = tpu.matmul %57, %58, %cst_25 {dimension_numbers = #tpu.dot_dimension_numbers<[1], [0], [0], [1], [0, 0, 1, 1], [], []>} : vector<16x48xbf16>, vector<48x32xbf16>, vector<16x32xf32> -> vector<16x32xf32>
    %c0_26 = arith.constant 0 : index
    %c0_27 = arith.constant 0 : index
    %60 = vector.load %arg5[%c0_26, %c0_27] : memref<16x1xf32, #tpu.memory_space<vmem>>, vector<16x1xf32>
    %61 = vector.broadcast %60 : vector<16x1xf32> to vector<16x32xf32>
    %62 = arith.addf %59, %61 : vector<16x32xf32>
    %63 = arith.addf %62, %35 : vector<16x32xf32>
    %cst_28 = arith.constant 0.000000e+00 : f32
    %64 = vector.broadcast %cst_28 : f32 to vector<16x32xf32>
    %65 = arith.maximumf %63, %64 : vector<16x32xf32>
    %c0_29 = arith.constant 0 : index
    %c0_30 = arith.constant 0 : index
    %66 = vector.load %arg8[%c0_29, %c0_30] : memref<16x32xf32, #tpu.memory_space<vmem>>, vector<16x32xf32>
    tpu.vector_store %arg8[%c0_29, %c0_30], %65 {strides = array<i32>} : memref<16x32xf32, #tpu.memory_space<vmem>>, vector<16x32xf32>,
    return
  }
  func.func @transform_0(%arg0: i32) -> (i32, i32) {
    %c0_i32 = arith.constant 0 : i32
    %c0_i32_0 = arith.constant 0 : i32
    %c0_i32_1 = arith.constant 0 : i32
    return %c0_i32, %c0_i32_0 : i32, i32
  }
  func.func @transform_1(%arg0: i32) -> (i32, i32) {
    %c0_i32 = arith.constant 0 : i32
    %c0_i32_0 = arith.constant 0 : i32
    %c0_i32_1 = arith.constant 0 : i32
    return %c0_i32, %c0_i32_0 : i32, i32
  }
  func.func @transform_2(%arg0: i32) -> (i32, i32) {
    %c0_i32 = arith.constant 0 : i32
    %c0_i32_0 = arith.constant 0 : i32
    %c0_i32_1 = arith.constant 0 : i32
    return %c0_i32, %c0_i32_0 : i32, i32
  }
  func.func @transform_3(%arg0: i32) -> (i32, i32) {
    %c0_i32 = arith.constant 0 : i32
    %c0_i32_0 = arith.constant 0 : i32
    %c0_i32_1 = arith.constant 0 : i32
    return %c0_i32, %c0_i32_0 : i32, i32
  }
  func.func @transform_4(%arg0: i32) -> (i32, i32) {
    %c0_i32 = arith.constant 0 : i32
    %c0_i32_0 = arith.constant 0 : i32
    %c0_i32_1 = arith.constant 0 : i32
    return %c0_i32, %c0_i32_0 : i32, i32
  }
  func.func @transform_5(%arg0: i32) -> (i32, i32) {
    %c0_i32 = arith.constant 0 : i32
    %c0_i32_0 = arith.constant 0 : i32
    %c0_i32_1 = arith.constant 0 : i32
    return %c0_i32, %c0_i32_0 : i32, i32
  }
  func.func @transform_6(%arg0: i32) -> (i32, i32) {
    %c0_i32 = arith.constant 0 : i32
    %c0_i32_0 = arith.constant 0 : i32
    %c0_i32_1 = arith.constant 0 : i32
    return %c0_i32, %c0_i32_0 : i32, i32
  }
  func.func @transform_7(%arg0: i32) -> (i32, i32) {
    %c0_i32 = arith.constant 0 : i32
    %c0_i32_0 = arith.constant 0 : i32
    %c0_i32_1 = arith.constant 0 : i32
    return %c0_i32, %c0_i32_0 : i32, i32
  }
}

module attributes {stable_mosaic.version = 11 : i64} {
  func.func @kernel(%arg0: i32, %arg1: memref<16x32xf32, #tpu.memory_space<vmem>>, %arg2: memref<16x48xbf16, #tpu.memory_space<vmem>>, %arg3: memref<16x1xf32, #tpu.memory_space<vmem>>, %arg4: memref<16x48xbf16, #tpu.memory_space<vmem>>, %arg5: memref<16x1xf32, #tpu.memory_space<vmem>>, %arg6: memref<32x2xf32, #tpu.memory_space<vmem>>, %arg7: memref<5x16xf32, #tpu.memory_space<vmem>>, %arg8: memref<5x1xf32, #tpu.memory_space<vmem>>, %arg9: memref<5x2xf32, #tpu.memory_space<vmem>>) attributes {dimension_semantics = [#tpu.dimension_semantics<arbitrary>], iteration_bounds = array<i64: 1>, scalar_prefetch = 0 : i64, scratch_operands = 0 : i64, tpu.core_type = #tpu.core_type<tc>, window_params = [{pipeline_mode = #tpu.pipeline_mode<synchronous>, transform_indices = @transform_0, window_bounds = array<i64: 16, 32>}, {pipeline_mode = #tpu.pipeline_mode<synchronous>, transform_indices = @transform_1, window_bounds = array<i64: 16, 48>}, {pipeline_mode = #tpu.pipeline_mode<synchronous>, transform_indices = @transform_2, window_bounds = array<i64: 16, 1>}, {pipeline_mode = #tpu.pipeline_mode<synchronous>, transform_indices = @transform_3, window_bounds = array<i64: 16, 48>}, {pipeline_mode = #tpu.pipeline_mode<synchronous>, transform_indices = @transform_4, window_bounds = array<i64: 16, 1>}, {pipeline_mode = #tpu.pipeline_mode<synchronous>, transform_indices = @transform_5, window_bounds = array<i64: 32, 2>}, {pipeline_mode = #tpu.pipeline_mode<synchronous>, transform_indices = @transform_6, window_bounds = array<i64: 5, 16>}, {pipeline_mode = #tpu.pipeline_mode<synchronous>, transform_indices = @transform_7, window_bounds = array<i64: 5, 1>}, {pipeline_mode = #tpu.pipeline_mode<synchronous>, transform_indices = @transform_8, window_bounds = array<i64: 5, 2>}]} {
    %c0 = arith.constant 0 : index
    %c0_0 = arith.constant 0 : index
    %0 = vector.load %arg1[%c0, %c0_0] : memref<16x32xf32, #tpu.memory_space<vmem>>, vector<16x32xf32>
    %cst = arith.constant 0.000000e+00 : f32
    %1 = vector.broadcast %cst : f32 to vector<16x4xf32>
    %2 = tpu.concatenate %1, %0 in 1 : vector<16x4xf32>, vector<16x32xf32> -> vector<16x36xf32>
    %3 = tpu.iota {dimensions = array<i32: 1>} : vector<16x32xi32>
    %c16_i32 = arith.constant 16 : i32
    %4 = vector.broadcast %c16_i32 : i32 to vector<16x32xi32>
    %5 = arith.cmpi sge, %3, %4 : vector<16x32xi32>
    %c16_i32_1 = arith.constant 16 : i32
    %c0_i32 = arith.constant 0 : i32
    %6 = vector.broadcast %c16_i32_1 : i32 to vector<16x32xi32>
    %7 = vector.broadcast %c0_i32 : i32 to vector<16x32xi32>
    %8 = arith.select %5, %6, %7 : vector<16x32xi1>, vector<16x32xi32>
    %9 = arith.subi %3, %8 : vector<16x32xi32>
    %10 = vector.extract_strided_slice %2 {offsets = [0, 0], sizes = [16, 32], strides = [1, 1]} : vector<16x36xf32> to vector<16x32xf32>
    %c4_i32 = arith.constant 4 : i32
    %11 = vector.broadcast %c4_i32 : i32 to vector<16x32xi32>
    %12 = arith.cmpi sge, %9, %11 : vector<16x32xi32>
    %cst_2 = arith.constant 0.000000e+00 : f32
    %13 = vector.broadcast %cst_2 : f32 to vector<16x32xf32>
    %14 = arith.select %12, %10, %13 : vector<16x32xi1>, vector<16x32xf32>
    %15 = vector.extract_strided_slice %2 {offsets = [0, 2], sizes = [16, 32], strides = [1, 1]} : vector<16x36xf32> to vector<16x32xf32>
    %c2_i32 = arith.constant 2 : i32
    %16 = vector.broadcast %c2_i32 : i32 to vector<16x32xi32>
    %17 = arith.cmpi sge, %9, %16 : vector<16x32xi32>
    %cst_3 = arith.constant 0.000000e+00 : f32
    %18 = vector.broadcast %cst_3 : f32 to vector<16x32xf32>
    %19 = arith.select %17, %15, %18 : vector<16x32xi1>, vector<16x32xf32>
    %20 = vector.extract_strided_slice %2 {offsets = [0, 4], sizes = [16, 32], strides = [1, 1]} : vector<16x36xf32> to vector<16x32xf32>
    %21 = tpu.concatenate %14, %19, %20 in 0 : vector<16x32xf32>, vector<16x32xf32>, vector<16x32xf32> -> vector<48x32xf32>
    %c0_4 = arith.constant 0 : index
    %c0_5 = arith.constant 0 : index
    %22 = vector.load %arg2[%c0_4, %c0_5] : memref<16x48xbf16, #tpu.memory_space<vmem>>, vector<16x48xbf16>
    %23 = arith.truncf %21 : vector<48x32xf32> to vector<48x32xbf16>
    %cst_6 = arith.constant dense<0.000000e+00> : vector<16x32xf32>
    %24 = tpu.matmul %22, %23, %cst_6 {dimension_numbers = #tpu.dot_dimension_numbers<[1], [0], [0], [1], [0, 0, 1, 1], [], []>} : vector<16x48xbf16>, vector<48x32xbf16>, vector<16x32xf32> -> vector<16x32xf32>
    %c0_7 = arith.constant 0 : index
    %c0_8 = arith.constant 0 : index
    %25 = vector.load %arg3[%c0_7, %c0_8] : memref<16x1xf32, #tpu.memory_space<vmem>>, vector<16x1xf32>
    %26 = vector.broadcast %25 : vector<16x1xf32> to vector<16x32xf32>
    %27 = arith.addf %24, %26 : vector<16x32xf32>
    %cst_9 = arith.constant 0.000000e+00 : f32
    %28 = vector.broadcast %cst_9 : f32 to vector<16x32xf32>
    %29 = arith.maximumf %27, %28 : vector<16x32xf32>
    %cst_10 = arith.constant 0.000000e+00 : f32
    %30 = vector.broadcast %cst_10 : f32 to vector<16x4xf32>
    %31 = tpu.concatenate %30, %29 in 1 : vector<16x4xf32>, vector<16x32xf32> -> vector<16x36xf32>
    %32 = tpu.iota {dimensions = array<i32: 1>} : vector<16x32xi32>
    %c16_i32_11 = arith.constant 16 : i32
    %33 = vector.broadcast %c16_i32_11 : i32 to vector<16x32xi32>
    %34 = arith.cmpi sge, %32, %33 : vector<16x32xi32>
    %c16_i32_12 = arith.constant 16 : i32
    %c0_i32_13 = arith.constant 0 : i32
    %35 = vector.broadcast %c16_i32_12 : i32 to vector<16x32xi32>
    %36 = vector.broadcast %c0_i32_13 : i32 to vector<16x32xi32>
    %37 = arith.select %34, %35, %36 : vector<16x32xi1>, vector<16x32xi32>
    %38 = arith.subi %32, %37 : vector<16x32xi32>
    %39 = vector.extract_strided_slice %31 {offsets = [0, 0], sizes = [16, 32], strides = [1, 1]} : vector<16x36xf32> to vector<16x32xf32>
    %c4_i32_14 = arith.constant 4 : i32
    %40 = vector.broadcast %c4_i32_14 : i32 to vector<16x32xi32>
    %41 = arith.cmpi sge, %38, %40 : vector<16x32xi32>
    %cst_15 = arith.constant 0.000000e+00 : f32
    %42 = vector.broadcast %cst_15 : f32 to vector<16x32xf32>
    %43 = arith.select %41, %39, %42 : vector<16x32xi1>, vector<16x32xf32>
    %44 = vector.extract_strided_slice %31 {offsets = [0, 2], sizes = [16, 32], strides = [1, 1]} : vector<16x36xf32> to vector<16x32xf32>
    %c2_i32_16 = arith.constant 2 : i32
    %45 = vector.broadcast %c2_i32_16 : i32 to vector<16x32xi32>
    %46 = arith.cmpi sge, %38, %45 : vector<16x32xi32>
    %cst_17 = arith.constant 0.000000e+00 : f32
    %47 = vector.broadcast %cst_17 : f32 to vector<16x32xf32>
    %48 = arith.select %46, %44, %47 : vector<16x32xi1>, vector<16x32xf32>
    %49 = vector.extract_strided_slice %31 {offsets = [0, 4], sizes = [16, 32], strides = [1, 1]} : vector<16x36xf32> to vector<16x32xf32>
    %50 = tpu.concatenate %43, %48, %49 in 0 : vector<16x32xf32>, vector<16x32xf32>, vector<16x32xf32> -> vector<48x32xf32>
    %c0_18 = arith.constant 0 : index
    %c0_19 = arith.constant 0 : index
    %51 = vector.load %arg4[%c0_18, %c0_19] : memref<16x48xbf16, #tpu.memory_space<vmem>>, vector<16x48xbf16>
    %52 = arith.truncf %50 : vector<48x32xf32> to vector<48x32xbf16>
    %cst_20 = arith.constant dense<0.000000e+00> : vector<16x32xf32>
    %53 = tpu.matmul %51, %52, %cst_20 {dimension_numbers = #tpu.dot_dimension_numbers<[1], [0], [0], [1], [0, 0, 1, 1], [], []>} : vector<16x48xbf16>, vector<48x32xbf16>, vector<16x32xf32> -> vector<16x32xf32>
    %c0_21 = arith.constant 0 : index
    %c0_22 = arith.constant 0 : index
    %54 = vector.load %arg5[%c0_21, %c0_22] : memref<16x1xf32, #tpu.memory_space<vmem>>, vector<16x1xf32>
    %55 = vector.broadcast %54 : vector<16x1xf32> to vector<16x32xf32>
    %56 = arith.addf %53, %55 : vector<16x32xf32>
    %57 = arith.addf %56, %0 : vector<16x32xf32>
    %cst_23 = arith.constant 0.000000e+00 : f32
    %58 = vector.broadcast %cst_23 : f32 to vector<16x32xf32>
    %59 = arith.maximumf %57, %58 : vector<16x32xf32>
    %c0_24 = arith.constant 0 : index
    %c0_25 = arith.constant 0 : index
    %60 = vector.load %arg6[%c0_24, %c0_25] : memref<32x2xf32, #tpu.memory_space<vmem>>, vector<32x2xf32>
    %cst_26 = arith.constant dense<0.000000e+00> : vector<16x2xf32>
    %61 = tpu.matmul %59, %60, %cst_26 {dimension_numbers = #tpu.dot_dimension_numbers<[1], [0], [0], [1], [0, 0, 1, 1], [], []>} : vector<16x32xf32>, vector<32x2xf32>, vector<16x2xf32> -> vector<16x2xf32>
    %c0_27 = arith.constant 0 : index
    %c0_28 = arith.constant 0 : index
    %62 = vector.load %arg7[%c0_27, %c0_28] : memref<5x16xf32, #tpu.memory_space<vmem>>, vector<5x16xf32>
    %cst_29 = arith.constant dense<0.000000e+00> : vector<5x2xf32>
    %63 = tpu.matmul %62, %61, %cst_29 {dimension_numbers = #tpu.dot_dimension_numbers<[1], [0], [0], [1], [0, 0, 1, 1], [], []>} : vector<5x16xf32>, vector<16x2xf32>, vector<5x2xf32> -> vector<5x2xf32>
    %c0_30 = arith.constant 0 : index
    %c0_31 = arith.constant 0 : index
    %64 = vector.load %arg8[%c0_30, %c0_31] : memref<5x1xf32, #tpu.memory_space<vmem>>, vector<5x1xf32>
    %65 = vector.broadcast %64 : vector<5x1xf32> to vector<5x2xf32>
    %66 = arith.addf %63, %65 : vector<5x2xf32>
    %c0_32 = arith.constant 0 : index
    %c0_33 = arith.constant 0 : index
    %67 = vector.load %arg9[%c0_32, %c0_33] : memref<5x2xf32, #tpu.memory_space<vmem>>, vector<5x2xf32>
    tpu.vector_store %arg9[%c0_32, %c0_33], %66 {strides = array<i32>} : memref<5x2xf32, #tpu.memory_space<vmem>>, vector<5x2xf32>,
    return
  }
  func.func @transform_0(%arg0: i32) -> (i32, i32) {
    %c0_i32 = arith.constant 0 : i32
    %c0_i32_0 = arith.constant 0 : i32
    %c0_i32_1 = arith.constant 0 : i32
    return %c0_i32, %c0_i32_0 : i32, i32
  }
  func.func @transform_1(%arg0: i32) -> (i32, i32) {
    %c0_i32 = arith.constant 0 : i32
    %c0_i32_0 = arith.constant 0 : i32
    %c0_i32_1 = arith.constant 0 : i32
    return %c0_i32, %c0_i32_0 : i32, i32
  }
  func.func @transform_2(%arg0: i32) -> (i32, i32) {
    %c0_i32 = arith.constant 0 : i32
    %c0_i32_0 = arith.constant 0 : i32
    %c0_i32_1 = arith.constant 0 : i32
    return %c0_i32, %c0_i32_0 : i32, i32
  }
  func.func @transform_3(%arg0: i32) -> (i32, i32) {
    %c0_i32 = arith.constant 0 : i32
    %c0_i32_0 = arith.constant 0 : i32
    %c0_i32_1 = arith.constant 0 : i32
    return %c0_i32, %c0_i32_0 : i32, i32
  }
  func.func @transform_4(%arg0: i32) -> (i32, i32) {
    %c0_i32 = arith.constant 0 : i32
    %c0_i32_0 = arith.constant 0 : i32
    %c0_i32_1 = arith.constant 0 : i32
    return %c0_i32, %c0_i32_0 : i32, i32
  }
  func.func @transform_5(%arg0: i32) -> (i32, i32) {
    %c0_i32 = arith.constant 0 : i32
    %c0_i32_0 = arith.constant 0 : i32
    %c0_i32_1 = arith.constant 0 : i32
    return %c0_i32, %c0_i32_0 : i32, i32
  }
  func.func @transform_6(%arg0: i32) -> (i32, i32) {
    %c0_i32 = arith.constant 0 : i32
    %c0_i32_0 = arith.constant 0 : i32
    %c0_i32_1 = arith.constant 0 : i32
    return %c0_i32, %c0_i32_0 : i32, i32
  }
  func.func @transform_7(%arg0: i32) -> (i32, i32) {
    %c0_i32 = arith.constant 0 : i32
    %c0_i32_0 = arith.constant 0 : i32
    %c0_i32_1 = arith.constant 0 : i32
    return %c0_i32, %c0_i32_0 : i32, i32
  }
  func.func @transform_8(%arg0: i32) -> (i32, i32) {
    %c0_i32 = arith.constant 0 : i32
    %c0_i32_0 = arith.constant 0 : i32
    %c0_i32_1 = arith.constant 0 : i32
    return %c0_i32, %c0_i32_0 : i32, i32
  }
}

</mosaic_0001>

<bundles_post_ra>
// kernel: tcn_forward.3
= control target key start
LH: loop header
LB: loop body
LE: loop exit
PB: predicated region body
PF: predicated region fallthrough
CT: control target
= control target key end

     0   :  { %s316_s9 = smov 4   ;;  %vm40_vm0 = vcmask 31744   ;;  %s317_s10 = smov 126   ;;  %v319_v10 = vmov 0   ;;  %v43_v13 = vlaneseq  ;;  %vm90_vm6 = vcmask 392192   ;;  %s446_s0 = inlined_call_operand.vmem [shape: f32[16,32], index: 0, kind: input, shape index: {}]   ;;  %s447_s2 = inlined_call_operand.vmem [shape: f32[16,1], index: 2, kind: input, shape index: {}]   ;;  %s448_s1 = inlined_call_operand.vmem [shape: bf16[16,48], index: 1, kind: input, shape index: {}]   ;;  %s449_s4 = inlined_call_operand.vmem [shape: f32[16,1], index: 4, kind: input, shape index: {}]   ;;  %s450_s7 = inlined_call_operand.vmem [shape: f32[5,1], index: 7, kind: input, shape index: {}]   ;;  %s451_s3 = inlined_call_operand.vmem [shape: bf16[16,48], index: 3, kind: input, shape index: {}]   ;;  %s452_s5 = inlined_call_operand.vmem [shape: f32[32,2], index: 5, kind: input, shape index: {}]   ;;  %s453_s6 = inlined_call_operand.vmem [shape: f32[5,16], index: 6, kind: input, shape index: {}]   ;;  %s454_s8 = inlined_call_operand.vmem [shape: f32[5,2], index: 8, kind: output, shape index: {}]  }
   0x1   :  { %v368_v0 = vld [vmem:[%s446_s0] sm:$0xff]  ;;  %v373_v1 = vld [vmem:[%s446_s0 + $0x8] sm:$0xff]  ;;  %s318_s0 = smov 124   ;;  %298 = vset.pattern.permute.xlu1 %v319_v10  ;;  %299 = vset.pattern.permute.xlu2 %v319_v10  ;;  %v184_v56 = vld [vmem:[%s452_s5 + $0x18] sm:$0xff]  ;;  %vm185_vm7 = vcmask 261120   ;;  %vm222_vm8 = vcmask 130048  }
   0x2   :  { %v283_v2 = vpack.i.bf16 %v373_v1, %v368_v0  ;;  %315 = vset.pattern.permute.xlu0 %v319_v10  ;;  %v73_v11 = vld [vmem:[%s447_s2] sm:$0xff]  ;;  %v74_v12 = vld [vmem:[%s447_s2 + $0x8] sm:$0xff]  ;;  %v44_v14 = vand.u32 127, %v43_v13  ;;  %204 = vmatpush.msra.mxu2 %v184_v56  ;;  %v183_v57 = vld [vmem:[%s452_s5 + $0x10] sm:$0xff]  ;;  %vm246_vm9 = vcmask 12288  }
   0x3   :  { %82 = vperm.xlu2 %299, %v74_v12   ;;  %v277_v27 = vld [vmem:[%s448_s1] sm:$0xff]  ;;  %v144_v46 = vld [vmem:[%s449_s4 + $0x8] sm:$0xff] }
   0x4   :  { %284 = vrot.lane.b32.xlu0 %v283_v2, %s316_s9  ;;  %vm45_vm1 = vcmp.ge.s32.totalorder %v44_v14, 16  ;;  %v143_v37 = vld [vmem:[%s449_s4] sm:$0xff]  ;;  %205 = vmatpush.msra.mxu2 %v183_v57  ;;  %v182_v58 = vld [vmem:[%s452_s5 + $0x8] sm:$0xff] }
   0x5   :  { %v46_v15 = vsel %vm45_vm1, 16, %v319_v10  ;;  %v216_v45 = vld [vmem:[%s450_s7] sm:$0x1f] }
   0x6   :  { %v47_v16 = vsub.s32 %v44_v14, %v46_v15  ;;  %v278_v55 = vld [vmem:[%s451_s3] sm:$0xff]  ;;  %206 = vmatpush.msra.mxu2 %v182_v58 }
   0x7   :  { %v181_v59 = vld [vmem:[%s452_s5] sm:$0xff] }
   0x8   :  { %vm51_vm2 = vcmp.ge.s32.totalorder %v47_v16, 2  ;;  %vm48_vm4 = vcmp.ge.s32.totalorder %v47_v16, 4  ;;  %207 = vmatpush.msra.mxu2 %v181_v59  ;;  %v215_v10 = vld [vmem:[%s453_s6] sm:$0x1f] }
   0x9   :  { %vm388_vm3 = vmpackc.low %vm51_vm2, %vm51_vm2 }
   0xa   :  { %vm394_vm5 = vmpackc.low %vm48_vm4, %vm48_vm4 }
  0x5d   :  { %v83_v30 = vpop.permute.xlu2 %82 }
  0x76   :  { %v285_v3 = vpop.permute.xlu0 %284 }
  0x77   :  { %v287_v4 = vunpack.i.h.bf16 %v285_v3  ;;  %v286_v5 = vunpack.i.l.bf16 %v285_v3 }
  0x79   :  { %v41_v6 = vsel %vm40_vm0, 0.0, %v286_v5  ;;  %v42_v7 = vsel %vm40_vm0, 0.0, %v287_v4 }
  0x7a   :  { %v293_v8 = vpack.i.bf16 %v42_v7, %v41_v6  ;;  %v260_v9 = vpack.c.bf16 %v42_v7, %v41_v6 }
  0x7c   :  { %294 = vrot.lane.b32.xlu1 %v293_v8, %s317_s10  ;;  %289 = vrot.lane.b32.xlu0 %v293_v8, %s318_s0 }
  0x84   :  { %77 = vperm.xlu1 %298, %v73_v11  }
  0xee   :  { %v295_v17 = vpop.permute.xlu1 %294  ;;  %v290_v18 = vpop.permute.xlu0 %289 }
  0xef   :  { %v292_v19 = vunpack.i.h.bf16 %v290_v18  ;;  %v291_v20 = vunpack.i.l.bf16 %v290_v18  ;;  %v297_v21 = vunpack.i.h.bf16 %v295_v17  ;;  %v296_v22 = vunpack.i.l.bf16 %v295_v17 }
  0xf1   :  { %v72_v23 = vpack.c.bf16 %v292_v19, %v291_v20  ;;  %v257_v25 = vpack.c.bf16 %v297_v21, %v296_v22 }
  0xf3   :  { %99 = vmatpush.bf16.msra.mxu0 %v72_v23 }
  0xf6   :  { %v78_v29 = vpop.permute.xlu1 %77 }
  0xf7   :  { %258 = vmatpush.bf16.msk.msra.mxu0 %vm388_vm3, %v257_v25 }
  0xfb   :  { %261 = vmatpush.bf16.msk.msra.mxu0 %vm394_vm5, %v260_v9 }
  0xfe   :  { %262 = vmatmul.msk.bf16.vlgmr.msra.gmra.mxu0 %vm90_vm6, %v277_v27 }
 0x17b   :  { %v103_v28 = vpop.f32.mrf.mxu0 }
 0x17c   :  { %v104_v31 = vadd.f32 %v103_v28, %v78_v29 }
 0x17e   :  { %v108_v34 = vmax.f32 %v104_v31, 0.0 }
 0x183   :  { %v105_v32 = vpop.f32.mrf.mxu0 }
 0x184   :  { %v106_v33 = vadd.f32 %v105_v32, %v83_v30 }
 0x186   :  { %v109_v35 = vmax.f32 %v106_v33, 0.0 }
 0x188   :  { %v300_v36 = vpack.i.bf16 %v109_v35, %v108_v34 }
 0x18a   :  { %301 = vrot.lane.b32.xlu2 %v300_v36, %s316_s9 }
 0x192   :  { %147 = vperm.xlu2 %299, %v143_v37  }
 0x1e4   :  { %v302_v38 = vpop.permute.xlu2 %301 }
 0x1e5   :  { %v304_v39 = vunpack.i.h.bf16 %v302_v38  ;;  %v303_v40 = vunpack.i.l.bf16 %v302_v38 }
 0x1e7   :  { %v119_v41 = vsel %vm40_vm0, 0.0, %v304_v39  ;;  %v118_v42 = vsel %vm40_vm0, 0.0, %v303_v40 }
 0x1e8   :  { %v310_v43 = vpack.i.bf16 %v119_v41, %v118_v42  ;;  %v271_v44 = vpack.c.bf16 %v119_v41, %v118_v42 }
 0x1ea   :  { %311 = vrot.lane.b32.xlu1 %v310_v43, %s317_s10  ;;  %306 = vrot.lane.b32.xlu0 %v310_v43, %s318_s0 }
 0x1ec   :  { %v148_v60 = vpop.permute.xlu2 %147 }
 0x1f2   :  { %219 = vperm.xlu1 %298, %v216_v45   ;;  %152 = vperm.xlu0 %315, %v144_v46  }
 0x25c   :  { %v312_v47 = vpop.permute.xlu1 %311  ;;  %v307_v48 = vpop.permute.xlu0 %306 }
 0x25d   :  { %v309_v49 = vunpack.i.h.bf16 %v307_v48  ;;  %v308_v50 = vunpack.i.l.bf16 %v307_v48  ;;  %v314_v51 = vunpack.i.h.bf16 %v312_v47  ;;  %v313_v52 = vunpack.i.l.bf16 %v312_v47 }
 0x25f   :  { %v142_v53 = vpack.c.bf16 %v309_v49, %v308_v50  ;;  %v268_v54 = vpack.c.bf16 %v314_v51, %v313_v52 }
 0x261   :  { %168 = vmatpush.bf16.msra.mxu1 %v142_v53 }
 0x264   :  { %v153_v3 = vpop.permute.xlu0 %152 }
 0x265   :  { %269 = vmatpush.bf16.msk.msra.mxu1 %vm388_vm3, %v268_v54 }
 0x269   :  { %272 = vmatpush.bf16.msk.msra.mxu1 %vm394_vm5, %v271_v44 }
 0x26c   :  { %273 = vmatmul.msk.bf16.vlgmr.msra.gmra.mxu1 %vm90_vm6, %v278_v55 }
 0x2e9   :  { %v172_v61 = vpop.f32.mrf.mxu1 }
 0x2ea   :  { %v173_v62 = vadd.f32 %v172_v61, %v148_v60 }
 0x2ec   :  { %v177_v63 = vadd.f32 %v173_v62, %v368_v0  ;;  %v220_v0 = vpop.permute.xlu1 %219 }
 0x2ee   :  { %v179_v2 = vmax.f32 %v177_v63, 0.0 }
 0x2f0   :  { %274 = vmatmul.msk.f32.vlgmr.msra.gmra.mxu2 %vm185_vm7, %v179_v2 }
 0x2f1   :  { %v174_v4 = vpop.f32.mrf.mxu1 }
 0x2f2   :  { %v175_v5 = vadd.f32 %v174_v4, %v153_v3 }
 0x2f4   :  { %v178_v6 = vadd.f32 %v175_v5, %v373_v1 }
 0x2f6   :  { %v180_v7 = vmax.f32 %v178_v6, 0.0 }
 0x2f8   :  { %275 = vmatmul.msk.f32.gmra.mxu2 %vm185_vm7, %v180_v7 }
 0x373   :  { %v209_v8 = vpop.f32.mrf.mxu2 }
 0x37b   :  { %v212_v9 = vpop.f32.mrf.mxu2 }
 0x37c   :  { %240 = vmatpush.msra.mxu3 %v212_v9 }
 0x37e   :  { %241 = vmatpush.msra.mxu3 %v209_v8 }
 0x37f   :  { %276 = vmatmul.msk.f32.vlgmr.msra.gmra.mxu3 %vm222_vm8, %v215_v10 }
 0x402   :  { %v243_v11 = vpop.f32.mrf.mxu3 }
 0x403   :  { %v244_v12 = vadd.f32 %v243_v11, %v220_v0 }
 0x405   :  { %247 = vst.msk [vmem:[%s454_s8] sm:$0x1f] %vm246_vm9, %v244_v12 }

// kernel: tcn_forward.2
= control target key start
LH: loop header
LB: loop body
LE: loop exit
PB: predicated region body
PF: predicated region fallthrough
CT: control target
= control target key end

     0   :  { %s264_s26 = smov 2   ;;  %vm32_vm0 = vcmask 15360   ;;  %s265_s27 = smov 127   ;;  %v267_v3 = vmov 0   ;;  %vm75_vm1 = vcmask 1043456   ;;  %vm115_vm2 = vcmask 64512   ;;  %s361_s0 = inlined_call_operand.vmem [shape: f32[8,32], index: 0, kind: input, shape index: {}]   ;;  %s362_s2 = inlined_call_operand.vmem [shape: f32[16,1], index: 2, kind: input, shape index: {}]   ;;  %s363_s5 = inlined_call_operand.vmem [shape: bf16[16,8], index: 5, kind: input, shape index: {}]   ;;  %s364_s1 = inlined_call_operand.vmem [shape: bf16[16,24], index: 1, kind: input, shape index: {}]   ;;  %s365_s6 = inlined_call_operand.vmem [shape: f32[16,1], index: 6, kind: input, shape index: {}]   ;;  %s366_s4 = inlined_call_operand.vmem [shape: f32[16,1], index: 4, kind: input, shape index: {}]   ;;  %s367_s3 = inlined_call_operand.vmem [shape: bf16[16,48], index: 3, kind: input, shape index: {}]   ;;  %s368_s7 = inlined_call_operand.vmem [shape: f32[16,32], index: 7, kind: output, shape index: {}]  }
   0x1   :  { %v27_v0 = vld [vmem:[%s361_s0] sm:$0xff]  ;;  %s266_s28 = smov 126   ;;  %246 = vset.pattern.permute.xlu1 %v267_v3  ;;  %247 = vset.pattern.permute.xlu2 %v267_v3  ;;  %v55_v6 = vld [vmem:[%s362_s2 + $0x8] sm:$0xff]  ;;  %v34_v9 = vlaneseq  ;;  %vm71_vm7 = vcmask 195584   ;;  %vm186_vm10 = vcmask 392192   ;;  %vm208_vm11 = vcmask 261120  }
   0x2   :  { %29 = vrot.lane.b32.xlu0 %v27_v0, %s264_s26  ;;  %v97_v4 = vpack.c.bf16 %v27_v0, %v27_v0  ;;  %v54_v5 = vld [vmem:[%s362_s2] sm:$0xff]  ;;  %63 = vperm.xlu2 %247, %v55_v6   ;;  %v170_v29 = vld [vmem:[%s366_s4 + $0x8] sm:$0xff] }
   0x3   :  { %263 = vset.pattern.permute.xlu0 %v267_v3  ;;  %v240_v8 = vld [vmem:[%s363_s5] sm:$0xff]  ;;  %v35_v10 = vand.u32 127, %v34_v9  ;;  %v99_v38 = vld [vmem:[%s365_s6 + $0x8] sm:$0xff] }
   0x4   :  { %v120_v7 = vsel %vm75_vm1, %v97_v4, 0  ;;  %v239_v18 = vld [vmem:[%s364_s1] sm:$0xff] }
   0x5   :  { %129 = vmatpush.bf16.msra.mxu1 %v120_v7  ;;  %vm36_vm3 = vcmp.ge.s32.totalorder %v35_v10, 16  ;;  %v98_v28 = vld [vmem:[%s365_s6] sm:$0xff] }
   0x6   :  { %v37_v11 = vsel %vm36_vm3, 16, %v267_v3  ;;  %v169_v37 = vld [vmem:[%s366_s4] sm:$0xff] }
   0x7   :  { %v38_v12 = vsub.s32 %v35_v10, %v37_v11  ;;  %v241_v47 = vld [vmem:[%s367_s3] sm:$0xff] }
   0x8   :  { %227 = vmatmul.msk.bf16.vlgmr.msra.gmra.mxu1 %vm115_vm2, %v240_v8 }
   0x9   :  { %vm39_vm4 = vcmp.ge.s32.totalorder %v38_v12, 2  ;;  %vm41_vm5 = vcmp.ge.s32.totalorder %v38_v12, 1 }
   0xa   :  { %vm219_vm6 = vmpackc.low %vm41_vm5, %vm39_vm4 }
   0xb   :  { %vm232_vm8 = vmpackc.low %vm41_vm5, %vm41_vm5 }
   0xc   :  { %vm235_vm9 = vmpackc.low %vm39_vm4, %vm39_vm4 }
  0x5c   :  { %v64_v21 = vpop.permute.xlu2 %63 }
  0x74   :  { %v30_v1 = vpop.permute.xlu0 %29 }
  0x75   :  { %v33_v2 = vsel %vm32_vm0, 0.0, %v30_v1 }
  0x76   :  { %43 = vrot.lane.b32.xlu1 %v33_v2, %s265_s27  ;;  %47 = vrot.lane.b32.xlu0 %v33_v2, %s266_s28 }
  0x7e   :  { %58 = vperm.xlu1 %246, %v54_v5  }
  0x85   :  { %v131_v49 = vpop.f32.mrf.mxu1 }
  0x8d   :  { %v133_v57 = vpop.f32.mrf.mxu1 }
  0xe8   :  { %v48_v13 = vpop.permute.xlu0 %47  ;;  %v44_v15 = vpop.permute.xlu1 %43 }
  0xe9   :  { %v53_v14 = vpack.c.bf16 %v48_v13, %v48_v13  ;;  %v220_v17 = vpack.c.bf16 %v44_v15, %v33_v2 }
  0xeb   :  { %v77_v16 = vsel %vm75_vm1, %v53_v14, 0 }
  0xec   :  { %85 = vmatpush.bf16.msra.mxu0 %v77_v16 }
  0xf0   :  { %221 = vmatpush.bf16.msk.msra.mxu0 %vm219_vm6, %v220_v17  ;;  %v59_v20 = vpop.permute.xlu1 %58 }
  0xf3   :  { %222 = vmatmul.msk.bf16.vlgmr.msra.gmra.mxu0 %vm71_vm7, %v239_v18 }
 0x170   :  { %v88_v19 = vpop.f32.mrf.mxu0 }
 0x171   :  { %v89_v22 = vadd.f32 %v88_v19, %v59_v20 }
 0x173   :  { %v93_v25 = vmax.f32 %v89_v22, 0.0 }
 0x178   :  { %v90_v23 = vpop.f32.mrf.mxu0 }
 0x179   :  { %v91_v24 = vadd.f32 %v90_v23, %v64_v21 }
 0x17b   :  { %v94_v26 = vmax.f32 %v91_v24, 0.0 }
 0x17d   :  { %v248_v27 = vpack.i.bf16 %v94_v26, %v93_v25 }
 0x17f   :  { %249 = vrot.lane.b32.xlu2 %v248_v27, %s264_s26 }
 0x187   :  { %102 = vperm.xlu2 %247, %v98_v28  }
 0x18f   :  { %178 = vperm.xlu2 %247, %v170_v29  }
 0x1d9   :  { %v250_v30 = vpop.permute.xlu2 %249 }
 0x1da   :  { %v252_v31 = vunpack.i.h.bf16 %v250_v30  ;;  %v251_v32 = vunpack.i.l.bf16 %v250_v30 }
 0x1dc   :  { %v145_v33 = vsel %vm32_vm0, 0.0, %v252_v31  ;;  %v144_v34 = vsel %vm32_vm0, 0.0, %v251_v32 }
 0x1dd   :  { %v258_v35 = vpack.i.bf16 %v145_v33, %v144_v34  ;;  %v236_v36 = vpack.c.bf16 %v145_v33, %v144_v34 }
 0x1df   :  { %259 = vrot.lane.b32.xlu1 %v258_v35, %s265_s27  ;;  %254 = vrot.lane.b32.xlu0 %v258_v35, %s266_s28 }
 0x1e1   :  { %v103_v48 = vpop.permute.xlu2 %102 }
 0x1e2   :  { %v132_v52 = vadd.f32 %v131_v49, %v103_v48 }
 0x1e7   :  { %173 = vperm.xlu1 %246, %v169_v37   ;;  %107 = vperm.xlu0 %263, %v99_v38  }
 0x1e9   :  { %v179_v58 = vpop.permute.xlu2 %178 }
 0x251   :  { %v260_v39 = vpop.permute.xlu1 %259  ;;  %v255_v40 = vpop.permute.xlu0 %254 }
 0x252   :  { %v257_v41 = vunpack.i.h.bf16 %v255_v40  ;;  %v256_v42 = vunpack.i.l.bf16 %v255_v40  ;;  %v262_v43 = vunpack.i.h.bf16 %v260_v39  ;;  %v261_v44 = vunpack.i.l.bf16 %v260_v39 }
 0x254   :  { %v168_v45 = vpack.c.bf16 %v257_v41, %v256_v42  ;;  %v233_v46 = vpack.c.bf16 %v262_v43, %v261_v44 }
 0x256   :  { %195 = vmatpush.bf16.msra.mxu2 %v168_v45 }
 0x259   :  { %v174_v50 = vpop.permute.xlu1 %173  ;;  %v108_v56 = vpop.permute.xlu0 %107 }
 0x25a   :  { %234 = vmatpush.bf16.msk.msra.mxu2 %vm232_vm8, %v233_v46  ;;  %v134_v60 = vadd.f32 %v133_v57, %v108_v56 }
 0x25e   :  { %237 = vmatpush.bf16.msk.msra.mxu2 %vm235_vm9, %v236_v36 }
 0x261   :  { %238 = vmatmul.msk.bf16.vlgmr.msra.gmra.mxu2 %vm186_vm10, %v241_v47 }
 0x2e4   :  { %v199_v51 = vpop.f32.mrf.mxu2 }
 0x2e5   :  { %v200_v53 = vadd.f32 %v199_v51, %v174_v50 }
 0x2e7   :  { %v204_v54 = vadd.f32 %v200_v53, %v132_v52 }
 0x2e9   :  { %v206_v55 = vmax.f32 %v204_v54, 0.0 }
 0x2eb   :  { %209 = vst.msk [vmem:[%s368_s7] sm:$0xff] %vm208_vm11, %v206_v55 }
 0x2ec   :  { %v201_v59 = vpop.f32.mrf.mxu2 }
 0x2ed   :  { %v202_v61 = vadd.f32 %v201_v59, %v179_v58 }
 0x2ef   :  { %v205_v62 = vadd.f32 %v202_v61, %v134_v60 }
 0x2f1   :  { %v207_v63 = vmax.f32 %v205_v62, 0.0 }
 0x2f3   :  { %210 = vst.msk [vmem:[%s368_s7 + $0x8] sm:$0xff] %vm208_vm11, %v207_v63 }

</bundles_post_ra>
